<compile_context>
chip_gen: v7x
topology: tpu7x:2x2x1
jax: 0.10.0
libtpu: 0.0.40
codegen_flags: <defaults>
</compile_context>

<pallas_src>
import jax
import jax.numpy as jnp
from jax.experimental import pallas as pl
from jax.experimental.pallas import tpu as pltpu


def _round_up(x, m):
    return ((x + m - 1) // m) * m


def _cdiv(a, b):
    return -(-a // b)


def _choose_fold(n_rows, latent_dim, target_lanes=256):
    """Largest power-of-two fold dividing n_rows so fold*latent ~ target lanes."""
    if latent_dim % 128 == 0:
        return 1
    fold = max(1, target_lanes // latent_dim)
    fold = 1 << (fold.bit_length() - 1)          # round down to a power of two
    while fold > 1 and n_rows % fold != 0:
        fold //= 2
    return fold


# ---------------------------------------------------------------------------
# Pallas kernel: one row-tile of the folded stream,
#   (tile_n, fold*D) @ (fold*D, fold*D) -> (tile_n, fold*D)
# with K_bd = kron(I_fold, K.T) so each D-wide lane segment is row @ K.T.
# Accumulation stays in float32 via preferred_element_type.
# ---------------------------------------------------------------------------
def koopman_apply_kernel(kbd_ref, z_ref, out_ref):
    out_ref[...] = jnp.dot(
        z_ref[...], kbd_ref[...],
        preferred_element_type=jnp.float32).astype(out_ref.dtype)


def strict_stable_koopman_forward(z, U_raw, V_raw, S_unconstrained,
                                  max_spectral_radius=0.99,
                                  tile_rows=2048):
    """Pallas implementation of StrictStableKoopmanOperator.forward.

    Returns (z_next, K, S).  z may be float32 or bfloat16; the kernel streams
    z in its native dtype (no extra HBM cast pass) and accumulates in f32.
    `tile_rows` is the folded-row tile size (raise to 4096-8192 on v7x).
    """
    latent_dim = U_raw.shape[0]

    # --- parameter prep (tiny, once per call, plain JAX/XLA) ---------------
    # TODO(synk): QR (Householder) orthogonalization has no Pallas/Mosaic
    # equivalent; it and the 32x32 operator build stay in XLA (a separate
    # pallas_call would cost more in launch/DMA overhead than it computes).
    U, _ = jnp.linalg.qr(U_raw)
    V, _ = jnp.linalg.qr(V_raw)
    S = jax.nn.sigmoid(S_unconstrained) * max_spectral_radius
    K = (U * S[None, :]) @ V.T                       # U @ diag(S) @ V.T

    # --- lane-densified streaming kernel for z_next = z @ K.T --------------
    lead_shape = z.shape[:-1]
    z2d = z.reshape(-1, latent_dim)
    n_rows = z2d.shape[0]

    fold = _choose_fold(n_rows, latent_dim)
    fold_dim = fold * latent_dim
    n_fold = n_rows // fold
    z_fold = z2d.reshape(n_fold, fold_dim)           # free contiguous reshape

    compute_dtype = z.dtype                          # bf16 only if upstream bf16
    out_dtype = z.dtype
    k_bd = jnp.kron(jnp.eye(fold, dtype=K.dtype), K.T).astype(compute_dtype)

    # Tile selection: big tiles amortize the fixed per-step pipeline cost,
    # but keep >=2 grid steps when possible so ("parallel",) shards across
    # both TensorCores on v7x.
    itemsize = jnp.dtype(compute_dtype).itemsize
    sub = max(8, 32 // itemsize)                     # sublane quantum: 8 f32 / 16 bf16
    if n_fold < 2 * sub:
        tile_n = n_fold                              # single full-extent block
    else:
        tile_n = min(tile_rows, _round_up(_cdiv(n_fold, 2), sub))
    num_tiles = _cdiv(n_fold, tile_n)                # partial last block: no pad/slice

    # Explicit VMEM budget: double-buffered z-in + out + resident K_bd.
    out_itemsize = jnp.dtype(out_dtype).itemsize
    footprint = (2 * tile_n * fold_dim * (itemsize + out_itemsize)
                 + 2 * fold_dim * fold_dim * itemsize)
    vmem_limit = int(min(max(2 * footprint + (4 << 20), 32 << 20), 48 << 20))

    z_next_fold = pl.pallas_call(
        koopman_apply_kernel,
        grid=(num_tiles,),
        out_shape=jax.ShapeDtypeStruct((n_fold, fold_dim), out_dtype),
        in_specs=[
            # K_bd: constant index map -> fetched once per core, VMEM-resident.
            pl.BlockSpec((fold_dim, fold_dim), lambda i: (0, 0)),
            # z: folded row tiles, software-pipelined (double-buffered DMA).
            pl.BlockSpec((tile_n, fold_dim), lambda i: (i, 0)),
        ],
        out_specs=pl.BlockSpec((tile_n, fold_dim), lambda i: (i, 0)),
        compiler_params=pltpu.CompilerParams(
            dimension_semantics=("parallel",),
            vmem_limit_bytes=vmem_limit),
        cost_estimate=pl.CostEstimate(
            flops=2 * n_fold * fold_dim * fold_dim,
            transcendentals=0,
            bytes_accessed=(n_fold * fold_dim * (itemsize + out_itemsize)
                            + fold_dim * fold_dim * itemsize)),
    )(k_bd, z_fold)

    z_next = z_next_fold.reshape(*lead_shape, latent_dim)
    return z_next, K, S


def _reference_forward(z, U_raw, V_raw, S_unconstrained,
                       max_spectral_radius=0.99):
    U, _ = jnp.linalg.qr(U_raw)
    V, _ = jnp.linalg.qr(V_raw)
    S = jax.nn.sigmoid(S_unconstrained) * max_spectral_radius
    K = U @ jnp.diag(S) @ V.T
    return z @ K.T, K, S


if __name__ == "__main__":
    latent_dim = 32
    key = jax.random.PRNGKey(0)
    k1, k2, k3, k4, k5, k6 = jax.random.split(key, 6)

    # Deterministic synthetic parameters (shapes from __init__).
    U_raw = jax.random.normal(k1, (latent_dim, latent_dim), dtype=jnp.float32)
    V_raw = jax.random.normal(k2, (latent_dim, latent_dim), dtype=jnp.float32)
    S_unc = jax.random.normal(k3, (latent_dim,), dtype=jnp.float32)

    # --- small shape: batch=2, seq=8 -> 16 rows, fold=8, single (2,256) block
    batch, seq = 2, 8
    z = jax.random.normal(k4, (batch, seq, latent_dim), dtype=jnp.float32)
    z_next, K, S = strict_stable_koopman_forward(z, U_raw, V_raw, S_unc)
    jax.block_until_ready((z_next, K, S))
    z_ref, K_ref, S_ref = _reference_forward(z, U_raw, V_raw, S_unc)
    assert z_next.shape == (batch, seq, latent_dim)
    assert K.shape == (latent_dim, latent_dim)
    assert S.shape == (latent_dim,)
    assert jnp.allclose(z_next, z_ref, atol=1e-5, rtol=1e-5)
    assert jnp.allclose(K, K_ref, atol=1e-5, rtol=1e-5)
    assert jnp.allclose(S, S_ref, atol=1e-6, rtol=1e-6)

    # --- larger ragged shape: 4*300=1200 rows -> fold=8, 150 folded rows,
    #     two parallel grid steps (80 + partial 70): exercises the masked
    #     partial last block with no wrapper-side pad/slice.
    z_big = jax.random.normal(k5, (4, 300, latent_dim), dtype=jnp.float32)
    zb, _, _ = strict_stable_koopman_forward(z_big, U_raw, V_raw, S_unc)
    jax.block_until_ready(zb)
    zb_ref, _, _ = _reference_forward(z_big, U_raw, V_raw, S_unc)
    assert zb.shape == (4, 300, latent_dim)
    assert jnp.allclose(zb, zb_ref, atol=1e-5, rtol=1e-5)

    # --- fold=1 fallback (row count not divisible by 2): 32-lane masked
    #     stores, still correct.
    z_odd = jax.random.normal(k6, (1, 7, latent_dim), dtype=jnp.float32)
    zo, _, _ = strict_stable_koopman_forward(z_odd, U_raw, V_raw, S_unc)
    jax.block_until_ready(zo)
    zo_ref, _, _ = _reference_forward(z_odd, U_raw, V_raw, S_unc)
    assert jnp.allclose(zo, zo_ref, atol=1e-5, rtol=1e-5)

    # --- bf16 path: z already bf16 upstream (no wrapper pre-cast HBM pass).
    z_bf = z_big.astype(jnp.bfloat16)
    zbf, K_bf, S_bf = strict_stable_koopman_forward(z_bf, U_raw, V_raw, S_unc)
    jax.block_until_ready(zbf)
    assert zbf.dtype == jnp.bfloat16
    zbf_ref = z_bf.astype(jnp.float32) @ K_ref.T
    assert jnp.allclose(K_bf, K_ref, atol=1e-5, rtol=1e-5)
    assert jnp.allclose(S_bf, S_ref, atol=1e-6, rtol=1e-6)
    assert jnp.allclose(zbf.astype(jnp.float32), zbf_ref, atol=5e-2, rtol=5e-2)

    print("KERNEL_OK")
</pallas_src>

<mosaic_0001>
module attributes {stable_mosaic.version = 11 : i64} {
  func.func @koopman_apply_kernel(%arg0: i32, %arg1: memref<256x256xf32, #tpu.memory_space<vmem>>, %arg2: memref<2x256xf32, #tpu.memory_space<vmem>>, %arg3: memref<2x256xf32, #tpu.memory_space<vmem>>) attributes {dimension_semantics = [#tpu.dimension_semantics<parallel>], iteration_bounds = array<i64: 1>, scalar_prefetch = 0 : i64, scratch_operands = 0 : i64, tpu.core_type = #tpu.core_type<tc>, window_params = [{pipeline_mode = #tpu.pipeline_mode<synchronous>, transform_indices = @transform_0, window_bounds = array<i64: 256, 256>}, {transform_indices = @transform_1, window_bounds = array<i64: 2, 256>}, {transform_indices = @transform_2, window_bounds = array<i64: 2, 256>}]} {
    %c0 = arith.constant 0 : index
    %c0_0 = arith.constant 0 : index
    %0 = vector.load %arg2[%c0, %c0_0] : memref<2x256xf32, #tpu.memory_space<vmem>>, vector<2x256xf32>
    %c0_1 = arith.constant 0 : index
    %c0_2 = arith.constant 0 : index
    %1 = vector.load %arg1[%c0_1, %c0_2] : memref<256x256xf32, #tpu.memory_space<vmem>>, vector<256x256xf32>
    %cst = arith.constant dense<0.000000e+00> : vector<2x256xf32>
    %2 = tpu.matmul %0, %1, %cst {dimension_numbers = #tpu.dot_dimension_numbers<[1], [0], [0], [1], [0, 0, 1, 1], [], []>} : vector<2x256xf32>, vector<256x256xf32>, vector<2x256xf32> -> vector<2x256xf32>
    %c0_3 = arith.constant 0 : index
    %c0_4 = arith.constant 0 : index
    %3 = vector.load %arg3[%c0_3, %c0_4] : memref<2x256xf32, #tpu.memory_space<vmem>>, vector<2x256xf32>
    tpu.vector_store %arg3[%c0_3, %c0_4], %2 {strides = array<i32>} : memref<2x256xf32, #tpu.memory_space<vmem>>, vector<2x256xf32>,
    return
  }
  func.func @transform_0(%arg0: i32) -> (i32, i32) {
    %c0_i32 = arith.constant 0 : i32
    %c0_i32_0 = arith.constant 0 : i32
    %c0_i32_1 = arith.constant 0 : i32
    return %c0_i32, %c0_i32_0 : i32, i32
  }
  func.func @transform_1(%arg0: i32) -> (i32, i32) {
    %c0_i32 = arith.constant 0 : i32
    %c0_i32_0 = arith.constant 0 : i32
    return %arg0, %c0_i32 : i32, i32
  }
  func.func @transform_2(%arg0: i32) -> (i32, i32) {
    %c0_i32 = arith.constant 0 : i32
    %c0_i32_0 = arith.constant 0 : i32
    return %arg0, %c0_i32 : i32, i32
  }
}

</mosaic_0001>

<bundles_post_ra>
// kernel: tpu_custom_call.1
= control target key start
LH: loop header
LB: loop body
LE: loop exit
PB: predicated region body
PF: predicated region fallthrough
CT: control target
= control target key end

     0   :  { %7 = vsyncpa [#allocation3], 0  ;;  %s417_s0 = inlined_call_operand.hbm [shape: f32[256,256], index: 0, kind: input, shape index: {}]   ;;  %s418_s1 = inlined_call_operand.hbm [shape: f32[2,256], index: 1, kind: input, shape index: {}]   ;;  %s419_s2 = inlined_call_operand.hbm [shape: f32[2,256], index: 2, kind: output, shape index: {}]  }
   0x1   :  { %8 = vsyncpa [#allocation6], 0 }
   0x2   :  { %9 = vsyncpa [#allocation4], 0  ;;  %s356_s9 = smov [#allocation2]   ;;  %s284_s13 = scalar_lea.hbm %s417_s0, 8192 }
   0x3   :  { %s15_s10 = sshll.u32 %s356_s9, 4  ;;  %p285_p0 = scmp.ne.s32.totalorder %s417_s0, %s284_s13  ;;  %s16_s10 = int_to_ptr.vmem [resolvable:$true] %s15_s10 }
   0x4   :  { %p288_p1 = scmp.lt.u32.totalorder %s284_s13, %s417_s0 }
   0x6   :  { %p290_p2 = pnand %p288_p1, %p285_p0 }
   0x8   :  { %293 = shalt.err (!%p290_p2)
}
   0x9   :  { %s294_s18 = scalar_lea.vmem %s16_s10, 8192  ;;  %p299_p4 = scmp.lt.s32.totalorder %s16_s10, %s16_s10 }
   0xa   :  { %p295_p3 = scmp.ne.s32.totalorder %s16_s10, %s294_s18  ;;  %p300_p5 = scmp.lt.s32.totalorder %s294_s18, %s294_s18 }
   0xc   :  { %p301_p6 = por %p300_p5, %p299_p4 }
   0xe   :  { %p302_p7 = pnand %p301_p6, %p295_p3 }
  0x10   :  { %305 = shalt.err (!%p302_p7)
}
  0x11   :  { %s357_s19 = smov 256   ;;  %s358_s20 = smov 16  }
  0x12   :  { %21 = dma.hbm_to_vmem [thread:$0]  %s417_s0, 8192, %s16_s10, [#allocation3], %s357_s19, %s357_s19, %s358_s20  }
  0x13   :  { %s359_s23 = smov [#allocation5]   ;;  %s306_s27 = scalar_lea.hbm %s418_s1, 64 }
  0x14   :  { %s28_s24 = sshll.u32 %s359_s23, 4  ;;  %p307_p8 = scmp.ne.s32.totalorder %s418_s1, %s306_s27  ;;  %s29_s24 = int_to_ptr.vmem [resolvable:$true] %s28_s24 }
  0x15   :  { %p310_p9 = scmp.lt.u32.totalorder %s306_s27, %s418_s1 }
  0x17   :  { %p312_p10 = pnand %p310_p9, %p307_p8 }
  0x19   :  { %315 = shalt.err (!%p312_p10)
}
  0x1a   :  { %s316_s4 = scalar_lea.vmem %s29_s24, 64  ;;  %p321_p12 = scmp.lt.s32.totalorder %s29_s24, %s29_s24 }
  0x1b   :  { %p317_p11 = scmp.ne.s32.totalorder %s29_s24, %s316_s4  ;;  %p322_p13 = scmp.lt.s32.totalorder %s316_s4, %s316_s4 }
  0x1d   :  { %p323_p0 = por %p322_p13, %p321_p12 }
  0x1f   :  { %p324_p1 = pnand %p323_p0, %p317_p11 }
  0x21   :  { %327 = shalt.err (!%p324_p1)
}
  0x22   :  { %31 = dma.hbm_to_vmem [thread:$0]  %s418_s1, 64, %s29_s24, [#allocation6]  }
  0x23   :  { %350 = dma.done.wait [#allocation3], 8192  }
  0x24   :  { %351 = vsyncadd [#allocation3], 4294959104 }
  0x25   :  { %352 = dma.done.wait [#allocation6], 64  }
  0x26   :  { %353 = vsyncadd [#allocation6], 4294967232  ;;  %v40_v0 = vld [vmem:[#allocation2 + $0x8] sm:$0xff]  ;;  %v42_v1 = vld [vmem:[#allocation2 + $0x18] sm:$0xff]  ;;  %s360_s1 = smov [#allocation7]  }
  0x27   :  { %v39_v2 = vld [vmem:[#allocation2] sm:$0xff]  ;;  %v215_v3 = vpack.c.bf16 %v42_v1, %v40_v0  ;;  %v41_v4 = vld [vmem:[#allocation2 + $0x10] sm:$0xff]  ;;  %v44_v5 = vld [vmem:[#allocation2 + $0x28] sm:$0xff]  ;;  %s203_s6 = sshll.u32 %s360_s1, 4  ;;  %s204_s6 = int_to_ptr.vmem [resolvable:$true] %s203_s6 }
  0x28   :  { %v46_v6 = vld [vmem:[#allocation2 + $0x38] sm:$0xff]  ;;  %v217_v7 = vpack.c.bf16 %v41_v4, %v39_v2  ;;  %v43_v9 = vld [vmem:[#allocation2 + $0x20] sm:$0xff]  ;;  %v45_v10 = vld [vmem:[#allocation2 + $0x30] sm:$0xff]  ;;  %s328_s7 = scalar_lea.vmem %s204_s6, 64  ;;  %p333_p3 = scmp.lt.s32.totalorder %s204_s6, %s204_s6 }
  0x29   :  { %v219_v8 = vpack.c.bf16 %v46_v6, %v44_v5  ;;  %v48_v11 = vld [vmem:[#allocation2 + $0x48] sm:$0xff]  ;;  %216 = vmatprep.subr.bf16.mxu0 %v215_v3  ;;  %v50_v12 = vld [vmem:[#allocation2 + $0x58] sm:$0xff]  ;;  %v221_v13 = vpack.c.bf16 %v45_v10, %v43_v9  ;;  %v47_v15 = vld [vmem:[#allocation2 + $0x40] sm:$0xff]  ;;  %p329_p2 = scmp.ne.s32.totalorder %s204_s6, %s328_s7  ;;  %p334_p4 = scmp.lt.s32.totalorder %s328_s7, %s328_s7 }
  0x2a   :  { %218 = vmatpush1.bf16.msra.mxu0 %v217_v7  ;;  %v223_v14 = vpack.c.bf16 %v50_v12, %v48_v11  ;;  %v49_v16 = vld [vmem:[#allocation2 + $0x50] sm:$0xff]  ;;  %v52_v17 = vld [vmem:[#allocation2 + $0x68] sm:$0xff]  ;;  %v54_v18 = vld [vmem:[#allocation2 + $0x78] sm:$0xff] }
  0x2b   :  { %220 = vmatprep.subr.bf16.mxu0 %v219_v8  ;;  %v225_v19 = vpack.c.bf16 %v49_v16, %v47_v15  ;;  %v227_v20 = vpack.c.bf16 %v54_v18, %v52_v17  ;;  %v51_v21 = vld [vmem:[#allocation2 + $0x60] sm:$0xff]  ;;  %v53_v22 = vld [vmem:[#allocation2 + $0x70] sm:$0xff]  ;;  %v56_v23 = vld [vmem:[#allocation2 + $0x88] sm:$0xff]  ;;  %p335_p5 = por %p334_p4, %p333_p3 }
  0x2c   :  { %v58_v24 = vld [vmem:[#allocation2 + $0x98] sm:$0xff]  ;;  %v229_v25 = vpack.c.bf16 %v53_v22, %v51_v21  ;;  %v55_v27 = vld [vmem:[#allocation2 + $0x80] sm:$0xff]  ;;  %v57_v28 = vld [vmem:[#allocation2 + $0x90] sm:$0xff] }
  0x2d   :  { %v231_v26 = vpack.c.bf16 %v58_v24, %v56_v23  ;;  %v60_v29 = vld [vmem:[#allocation2 + $0xa8] sm:$0xff]  ;;  %v62_v30 = vld [vmem:[#allocation2 + $0xb8] sm:$0xff]  ;;  %v233_v31 = vpack.c.bf16 %v57_v28, %v55_v27  ;;  %v59_v33 = vld [vmem:[#allocation2 + $0xa0] sm:$0xff]  ;;  %p336_p6 = pnand %p335_p5, %p329_p2 }
  0x2e   :  { %222 = vmatpush1.bf16.msra.mxu0 %v221_v13  ;;  %v235_v32 = vpack.c.bf16 %v62_v30, %v60_v29  ;;  %v61_v34 = vld [vmem:[#allocation2 + $0xb0] sm:$0xff]  ;;  %v64_v35 = vld [vmem:[#allocation2 + $0xc8] sm:$0xff]  ;;  %v66_v36 = vld [vmem:[#allocation2 + $0xd8] sm:$0xff] }
  0x2f   :  { %224 = vmatprep.subr.bf16.mxu0 %v223_v14  ;;  %v237_v37 = vpack.c.bf16 %v61_v34, %v59_v33  ;;  %v239_v38 = vpack.c.bf16 %v66_v36, %v64_v35  ;;  %v63_v39 = vld [vmem:[#allocation2 + $0xc0] sm:$0xff]  ;;  %v65_v40 = vld [vmem:[#allocation2 + $0xd0] sm:$0xff]  ;;  %v68_v42 = vld [vmem:[#allocation2 + $0xe8] sm:$0xff] }
  0x30   :  { %v400_v41 = vld.sshfl [vmem:[#allocation5] sm:$0x33 pattern:$0x76325410]  ;;  %v70_v43 = vld [vmem:[#allocation2 + $0xf8] sm:$0xff]  ;;  %v241_v45 = vpack.c.bf16 %v65_v40, %v63_v39  ;;  %v69_v48 = vld [vmem:[#allocation2 + $0xf0] sm:$0xff] }
  0x31   :  { %v111_v44 = vcombine.high %v400_v41, %v400_v41  ;;  %v243_v46 = vpack.c.bf16 %v70_v43, %v68_v42  ;;  %v67_v47 = vld [vmem:[#allocation2 + $0xe0] sm:$0xff]  ;;  %v72_v49 = vld [vmem:[#allocation2 + $0x108] sm:$0xff]  ;;  %v74_v50 = vld [vmem:[#allocation2 + $0x118] sm:$0xff] }
  0x32   :  { %226 = vmatpush1.bf16.msra.mxu0 %v225_v19  ;;  %v245_v51 = vpack.c.bf16 %v69_v48, %v67_v47  ;;  %v247_v52 = vpack.c.bf16 %v74_v50, %v72_v49  ;;  %v71_v53 = vld [vmem:[#allocation2 + $0x100] sm:$0xff]  ;;  %v73_v54 = vld [vmem:[#allocation2 + $0x110] sm:$0xff]  ;;  %v76_v55 = vld [vmem:[#allocation2 + $0x128] sm:$0xff] }
  0x33   :  { %228 = vmatprep.subr.bf16.mxu0 %v227_v20  ;;  %178 = vmatprep.mubr.f32.mxu0 %v111_v44  ;;  %v78_v56 = vld [vmem:[#allocation2 + $0x138] sm:$0xff]  ;;  %v249_v57 = vpack.c.bf16 %v73_v54, %v71_v53  ;;  %v75_v59 = vld [vmem:[#allocation2 + $0x120] sm:$0xff]  ;;  %v77_v60 = vld [vmem:[#allocation2 + $0x130] sm:$0xff] }
  0x34   :  { %v251_v58 = vpack.c.bf16 %v78_v56, %v76_v55  ;;  %v80_v61 = vld [vmem:[#allocation2 + $0x148] sm:$0xff]  ;;  %v82_v62 = vld [vmem:[#allocation2 + $0x158] sm:$0xff]  ;;  %v253_v63 = vpack.c.bf16 %v77_v60, %v75_v59  ;;  %v79_v1 = vld [vmem:[#allocation2 + $0x140] sm:$0xff] }
  0x35   :  { %v255_v0 = vpack.c.bf16 %v82_v62, %v80_v61  ;;  %v81_v2 = vld [vmem:[#allocation2 + $0x150] sm:$0xff]  ;;  %v84_v3 = vld [vmem:[#allocation2 + $0x168] sm:$0xff]  ;;  %v86_v4 = vld [vmem:[#allocation2 + $0x178] sm:$0xff] }
  0x36   :  { %230 = vmatpush1.bf16.msra.mxu0 %v229_v25  ;;  %v257_v5 = vpack.c.bf16 %v81_v2, %v79_v1  ;;  %v259_v6 = vpack.c.bf16 %v86_v4, %v84_v3  ;;  %v83_v7 = vld [vmem:[#allocation2 + $0x160] sm:$0xff]  ;;  %v85_v8 = vld [vmem:[#allocation2 + $0x170] sm:$0xff]  ;;  %v88_v9 = vld [vmem:[#allocation2 + $0x188] sm:$0xff] }
  0x37   :  { %232 = vmatprep.subr.bf16.mxu0 %v231_v26  ;;  %v90_v10 = vld [vmem:[#allocation2 + $0x198] sm:$0xff]  ;;  %v261_v11 = vpack.c.bf16 %v85_v8, %v83_v7  ;;  %v87_v13 = vld [vmem:[#allocation2 + $0x180] sm:$0xff]  ;;  %v89_v14 = vld [vmem:[#allocation2 + $0x190] sm:$0xff] }
  0x38   :  { %v263_v12 = vpack.c.bf16 %v90_v10, %v88_v9  ;;  %v92_v15 = vld [vmem:[#allocation2 + $0x1a8] sm:$0xff]  ;;  %v94_v16 = vld [vmem:[#allocation2 + $0x1b8] sm:$0xff]  ;;  %v265_v17 = vpack.c.bf16 %v89_v14, %v87_v13  ;;  %v91_v19 = vld [vmem:[#allocation2 + $0x1a0] sm:$0xff] }
  0x39   :  { %v267_v18 = vpack.c.bf16 %v94_v16, %v92_v15  ;;  %v93_v20 = vld [vmem:[#allocation2 + $0x1b0] sm:$0xff]  ;;  %v96_v21 = vld [vmem:[#allocation2 + $0x1c8] sm:$0xff]  ;;  %v98_v22 = vld [vmem:[#allocation2 + $0x1d8] sm:$0xff] }
  0x3a   :  { %234 = vmatpush1.bf16.msra.mxu0 %v233_v31  ;;  %v269_v23 = vpack.c.bf16 %v93_v20, %v91_v19  ;;  %v271_v24 = vpack.c.bf16 %v98_v22, %v96_v21  ;;  %v95_v25 = vld [vmem:[#allocation2 + $0x1c0] sm:$0xff]  ;;  %v97_v26 = vld [vmem:[#allocation2 + $0x1d0] sm:$0xff]  ;;  %v100_v27 = vld [vmem:[#allocation2 + $0x1e8] sm:$0xff] }
  0x3b   :  { %236 = vmatprep.subr.bf16.mxu0 %v235_v32  ;;  %v102_v28 = vld [vmem:[#allocation2 + $0x1f8] sm:$0xff]  ;;  %v273_v29 = vpack.c.bf16 %v97_v26, %v95_v25  ;;  %v99_v31 = vld [vmem:[#allocation2 + $0x1e0] sm:$0xff]  ;;  %v101_v32 = vld [vmem:[#allocation2 + $0x1f0] sm:$0xff] }
  0x3c   :  { %v275_v30 = vpack.c.bf16 %v102_v28, %v100_v27  ;;  %v277_v33 = vpack.c.bf16 %v101_v32, %v99_v31 }
  0x3e   :  { %238 = vmatpush1.bf16.msra.mxu0 %v237_v37 }
  0x3f   :  { %240 = vmatprep.subr.bf16.mxu0 %v239_v38 }
  0x42   :  { %242 = vmatpush1.bf16.msra.mxu0 %v241_v45 }
  0x43   :  { %244 = vmatprep.subr.bf16.mxu0 %v243_v46 }
  0x46   :  { %246 = vmatpush1.bf16.msra.mxu0 %v245_v51 }
  0x47   :  { %248 = vmatprep.subr.bf16.mxu0 %v247_v52 }
  0x4a   :  { %250 = vmatpush1.bf16.msra.mxu0 %v249_v57 }
  0x4b   :  { %252 = vmatprep.subr.bf16.mxu0 %v251_v58 }
  0x4e   :  { %254 = vmatpush1.bf16.msra.mxu0 %v253_v63 }
  0x4f   :  { %256 = vmatprep.subr.bf16.mxu0 %v255_v0 }
  0x52   :  { %258 = vmatpush1.bf16.msra.mxu0 %v257_v5 }
  0x53   :  { %260 = vmatprep.subr.bf16.mxu0 %v259_v6 }
  0x56   :  { %262 = vmatpush1.bf16.msra.mxu0 %v261_v11 }
  0x57   :  { %264 = vmatprep.subr.bf16.mxu0 %v263_v12 }
  0x5a   :  { %266 = vmatpush1.bf16.msra.mxu0 %v265_v17 }
  0x5b   :  { %268 = vmatprep.subr.bf16.mxu0 %v267_v18 }
  0x5e   :  { %270 = vmatpush1.bf16.msra.mxu0 %v269_v23 }
  0x5f   :  { %272 = vmatprep.subr.bf16.mxu0 %v271_v24 }
  0x62   :  { %274 = vmatpush1.bf16.msra.mxu0 %v273_v29 }
  0x63   :  { %276 = vmatprep.subr.bf16.mxu0 %v275_v30 }
  0x66   :  { %278 = vmatpush1.bf16.msra.mxu0 %v277_v33 }
  0x69   :  { %179 = vmatmul.mubr.f32.vlgmr.msra.gmra.mrb[0].mxu0 %v400_v41 }
 0x13c   :  { %v180_v34 = vpop.f32.mrb[0].mxu0 }
 0x13d   :  { %v182_v35 = vpop.f32.mrb[1].mxu0 }
 0x13e   :  { %v187_v36 = vcombine.low %v180_v34, %v182_v35 }
 0x140   :  { %214 = vst.sshfl [vmem:[#allocation7] sm:$0x33 pattern:$0x76325410] %v187_v36 }
 0x141   :  { %339 = shalt.err (!%p336_p6)
}
 0x142   :  { %s340_s10 = scalar_lea.hbm %s419_s2, 64 }
 0x143   :  { %p341_p7 = scmp.ne.s32.totalorder %s419_s2, %s340_s10  ;;  %p344_p8 = scmp.lt.u32.totalorder %s340_s10, %s419_s2 }
 0x145   :  { %p346_p9 = pnand %p344_p8, %p341_p7 }
 0x147   :  { %349 = shalt.err (!%p346_p9)
}
 0x148   :  { %206 = dma.vmem_to_hbm [thread:$0]  %s204_s6, 64, %s419_s2, [#allocation4]  }
 0x149   :  { %354 = dma.done.wait [#allocation4], 64  }
 0x14a   :  { %355 = vsyncadd [#allocation4], 4294967232 }
 0x14b   :  { %210 = vsyncpa [#allocation3], 1 }
 0x14c   :  { %211 = vsyncpa [#allocation6], 1 }
 0x14d   :  { %212 = vsyncpa [#allocation4], 1 }

</bundles_post_ra>
